<compile_context>
chip_gen: v7x
topology: tpu7x:2x2x1
jax: 0.10.0
libtpu: 0.0.40
codegen_flags: <defaults>
</compile_context>

<pallas_src>
import numpy as np

import jax
import jax.numpy as jnp
from jax.experimental import pallas as pl
from jax.experimental.pallas import tpu as pltpu


def _round_up(v, m):
    return (v + m - 1) // m * m


# --------------------------------------------------------------------------
# Kernel
# --------------------------------------------------------------------------
def _gf2d_kernel(x_ref, ft_ref, g_ref, w_ref, fi_ref, o_ref):
    """One batch sub-block.

    x_ref : (1, bb*C, T)   f32  input slab (rows = (b, c), lanes = t)
    ft_ref: (T, 2*Tf)      bf16 packed rfft matrix   [Fc | Fs]
    g_ref : (2, 2C, 2C)    bf16 packed C-axis FFT / inverse-FFT matrices
    w_ref : (2, C, bb*Tf)  f32  filter weight, tiled over the batch lanes
    fi_ref: (2*Tf, Tpad)   bf16 packed irfft matrix  [Ic ; Is] (zero-padded)
    o_ref : (1, bb*C, Tpad) f32
    """
    _, bbC, T = x_ref.shape
    C = g_ref.shape[1] // 2
    bb = bbC // C
    Tf = ft_ref.shape[1] // 2
    f32 = jnp.float32
    bf16 = jnp.bfloat16

    # ---- rfft along T: one 2-D matmul, batch folded into M ----------------
    xb = x_ref[0].astype(bf16)                                   # (bb*C, T)
    y = jnp.dot(xb, ft_ref[...], preferred_element_type=f32)     # (bb*C, 2Tf)

    # ---- corner turn 1: (bb*C, 2Tf) -> channel-stacked (2C, bb*Tf) --------
    yr = jnp.concatenate(
        [y[i * C:(i + 1) * C, :Tf] for i in range(bb)], axis=1)  # (C, bb*Tf)
    yi = jnp.concatenate(
        [y[i * C:(i + 1) * C, Tf:] for i in range(bb)], axis=1)  # (C, bb*Tf)
    ystk = jnp.concatenate([yr, yi], axis=0).astype(bf16)        # (2C, bb*Tf)

    # ---- full FFT along C: one (2C,2C)@(2C,bb*Tf) matmul, batch in N ------
    z = jnp.dot(g_ref[0], ystk, preferred_element_type=f32)      # (2C, bb*Tf)

    # ---- complex pointwise filter (kept f32 on the VPU) -------------------
    zr, zi = z[:C], z[C:]
    wr, wi = w_ref[0], w_ref[1]                                  # (C, bb*Tf)
    p = jnp.concatenate([zr * wr - zi * wi, zr * wi + zi * wr], axis=0)
    p = p.astype(bf16)                                           # (2C, bb*Tf)

    # ---- inverse FFT along C ----------------------------------------------
    u = jnp.dot(g_ref[1], p, preferred_element_type=f32)         # (2C, bb*Tf)

    # ---- corner turn 2: (2C, bb*Tf) -> (bb*C, 2Tf) ------------------------
    u2 = jnp.concatenate(
        [jnp.concatenate([u[:C, i * Tf:(i + 1) * Tf],
                          u[C:, i * Tf:(i + 1) * Tf]], axis=1)
         for i in range(bb)], axis=0).astype(bf16)               # (bb*C, 2Tf)

    # ---- irfft along T: batch in M; Fi is zero-padded to Tpad lanes so the
    # ---- store is lane-dense (no masked vst) ------------------------------
    out = jnp.dot(u2, fi_ref[...], preferred_element_type=f32)   # (bb*C, Tpad)
    o_ref[0] = out.astype(o_ref.dtype)


# --------------------------------------------------------------------------
# Constants / helpers
# --------------------------------------------------------------------------
def _gf2d_constants(C, T, t_pad):
    """Packed ortho-normalised real DFT matrices (stored bf16 for the MXU)."""
    Tf = T // 2 + 1
    t = np.arange(T)[:, None]
    k = np.arange(Tf)[None, :]
    ang_t = 2.0 * np.pi * t * k / T
    fc = np.cos(ang_t) / np.sqrt(T)                  # (T, Tf)  rfft, real part
    fs = -np.sin(ang_t) / np.sqrt(T)                 # (T, Tf)  rfft, imag part

    c = np.arange(C)
    ang_c = 2.0 * np.pi * np.outer(c, c) / C
    gc = np.cos(ang_c) / np.sqrt(C)                  # (C, C)
    gs = np.sin(ang_c) / np.sqrt(C)                  # (C, C)

    # irfft: Hermitian-extension weights (DC / Nyquist counted once, imag
    # parts of DC / Nyquist dropped -- matches np.fft.irfft / torch.fft.irfft).
    a = np.full((Tf,), 2.0)
    b = np.full((Tf,), 2.0)
    a[0] = 1.0
    b[0] = 0.0
    if T % 2 == 0:
        a[-1] = 1.0
        b[-1] = 0.0
    ang_i = 2.0 * np.pi * np.arange(Tf)[:, None] * np.arange(T)[None, :] / T
    ic = a[:, None] * np.cos(ang_i) / np.sqrt(T)     # (Tf, T)
    is_ = -b[:, None] * np.sin(ang_i) / np.sqrt(T)   # (Tf, T)

    f_pack = np.concatenate([fc, fs], axis=1)                      # (T, 2Tf)
    g_pack = np.stack([np.block([[gc, gs], [-gs, gc]]),            # forward
                       np.block([[gc, -gs], [gs, gc]])], axis=0)   # inverse
    fi_pack = np.zeros((2 * Tf, t_pad))                            # lane-dense
    fi_pack[:, :T] = np.concatenate([ic, is_], axis=0)             # (2Tf, Tpad)
    return (jnp.asarray(f_pack, jnp.bfloat16),
            jnp.asarray(g_pack, jnp.bfloat16),
            jnp.asarray(fi_pack, jnp.bfloat16))


def _interp_linear_align_corners(w, out_size):
    """F.interpolate(..., mode='linear', align_corners=True) along axis=1.
    w: (dim, L, 2) -> (dim, out_size, 2)."""
    L = w.shape[1]
    if out_size == L:
        return w
    if out_size == 1:
        return w[:, :1]
    pos = jnp.arange(out_size, dtype=jnp.float32) * ((L - 1) / (out_size - 1))
    i0 = jnp.clip(jnp.floor(pos).astype(jnp.int32), 0, L - 2)
    frac = (pos - i0.astype(jnp.float32))[None, :, None]
    left = jnp.take(w, i0, axis=1)
    right = jnp.take(w, i0 + 1, axis=1)
    return left * (1.0 - frac) + right * frac


def _pick_bb(B, C, T, Tf, t_pad):
    """Largest batch sub-block with (a) >= 2 grid programs whenever B >= 2
    (both v7x TensorCores stay busy) and (b) per-block data footprint well
    under v7x's 64 MiB physical VMEM."""
    budget = 40 << 20
    best = 1
    for d in range(1, B + 1):
        if B % d:
            continue
        if B >= 2 and B // d < 2:            # keep the grid >= 2 programs
            continue
        blocks = 2 * d * C * T * 4 + 2 * d * C * t_pad * 4   # x/out, 2-buffered
        w_b = 2 * C * d * Tf * 4                              # tiled filter
        interm = 8 * d * C * 2 * Tf * 4                       # live f32 values
        if blocks + w_b + interm <= budget:
            best = max(best, d)
    return best


def _vmem_limit_bytes(bb, C, T, Tf, t_pad):
    """Scoped-VMEM request derived from the actual footprint (v5e's default
    scoped limit is only 16 MiB; v7x's physical VMEM is 64 MiB)."""
    tf2 = 2 * Tf
    const_b = T * tf2 * 2 + 2 * (2 * C) ** 2 * 2 + tf2 * t_pad * 2 \
        + 2 * C * bb * Tf * 4
    block_b = 2 * bb * C * T * 4 + 2 * bb * C * t_pad * 4
    interm_b = 8 * bb * C * tf2 * 4
    need = int(1.5 * (const_b + block_b + interm_b)) + (8 << 20)
    return max(32 << 20, min(64 << 20, need))


def _const_spec(shape):
    """BlockSpec for a constant operand: block 0 every step, single buffer."""
    def index_map(i):
        return (0,) * len(shape)
    try:
        return pl.BlockSpec(shape, index_map, pipeline_mode=pl.Buffered(1))
    except TypeError:
        # Older jax without BlockSpec.pipeline_mode: fall back to the default
        # (double-buffered) constant -- correct, just wastes some VMEM.
        return pl.BlockSpec(shape, index_map)


# --------------------------------------------------------------------------
# Forward
# --------------------------------------------------------------------------
@jax.jit
def gf2d_forward(x, complex_weight):
    """GF2d.forward.  x: (B, C, T) float32, complex_weight: (dim, Tw, 2)."""
    B, C, T = x.shape
    Tf = T // 2 + 1
    t_pad = _round_up(T, 128)

    # --- weight handling: same branch structure as the torch forward -------
    w = complex_weight
    if w.shape[1] != C:
        w = _interp_linear_align_corners(w, C)
    # GF2d's `x * weight` broadcast is only valid when dim broadcasts against
    # C and the (interpolated) weight length broadcasts against Tf = T//2+1.
    if w.shape[0] not in (1, C) or w.shape[1] not in (1, Tf):
        raise ValueError(
            f"complex_weight of shape {complex_weight.shape} does not "
            f"broadcast onto the rfft2 output (B, {C}, {Tf})")
    wr = jnp.broadcast_to(w[..., 0].astype(jnp.float32), (C, Tf))
    wi = jnp.broadcast_to(w[..., 1].astype(jnp.float32), (C, Tf))

    bb = _pick_bb(B, C, T, Tf, t_pad)
    grid = (B // bb,)

    # Filter weight tiled over the batch lanes of the channel-stacked layout
    # (lanes of the G matmuls are ordered (b, f)); kept f32 for the VPU.
    w_pack = jnp.tile(jnp.stack([wr, wi], axis=0), (1, 1, bb))  # (2, C, bb*Tf)

    f_pack, g_pack, fi_pack = _gf2d_constants(C, T, t_pad)

    # Present x as (grid, bb*C, T): the T-axis matmuls then run with the batch
    # folded into M without any in-kernel row reshape, and the block's last
    # two dims equal the full array dims (satisfies the (8,128) rule).
    x3 = x.astype(jnp.float32).reshape(B // bb, bb * C, T)

    out3 = pl.pallas_call(
        _gf2d_kernel,
        out_shape=jax.ShapeDtypeStruct((B // bb, bb * C, t_pad), jnp.float32),
        grid_spec=pltpu.PrefetchScalarGridSpec(
            num_scalar_prefetch=0,
            grid=grid,
            in_specs=[
                pl.BlockSpec((1, bb * C, T), lambda i: (i, 0, 0)),   # x slab
                _const_spec((T, 2 * Tf)),                            # [Fc | Fs]
                _const_spec((2, 2 * C, 2 * C)),                      # G fwd/inv
                _const_spec((2, C, bb * Tf)),                        # W re/im
                _const_spec((2 * Tf, t_pad)),                        # [Ic ; Is]
            ],
            out_specs=pl.BlockSpec((1, bb * C, t_pad), lambda i: (i, 0, 0)),
        ),
        compiler_params=pltpu.CompilerParams(
            dimension_semantics=("parallel",),
            vmem_limit_bytes=_vmem_limit_bytes(bb, C, T, Tf, t_pad)),
    )(x3, f_pack, g_pack, w_pack, fi_pack)

    # Strip the lane padding (no-op when T is already a multiple of 128).
    return out3.reshape(B, C, t_pad)[..., :T]


# --------------------------------------------------------------------------
# Demo / self-test
# --------------------------------------------------------------------------
if __name__ == "__main__":
    # Shapes implied by GF2d.forward: the `x * weight` broadcast needs
    # C == T//2+1 and dim == C.  B=4 exercises both the batch folding
    # (bb = 2) and a 2-program grid (both v7x TensorCores).
    B, T = 4, 16
    C = T // 2 + 1            # 9
    dim = C                   # 9
    T_module = 200            # module default -> exercises the interpolate path

    key = jax.random.PRNGKey(0)
    kx, kw = jax.random.split(key)
    x = jax.random.normal(kx, (B, C, T), dtype=jnp.float32)
    # trunc_normal_(std=0.02): truncated normal on [-2, 2] sigmas, scaled.
    complex_weight = 0.02 * jax.random.truncated_normal(
        kw, -2.0, 2.0, (dim, T_module // 2 + 1, 2), dtype=jnp.float32)

    out = jax.block_until_ready(gf2d_forward(x, complex_weight))
    assert out.shape == (B, C, T) and out.dtype == jnp.float32

    # Reference (torch.fft.rfft2 / irfft2 semantics, norm='ortho').
    w = complex_weight
    if w.shape[1] != C:
        w = _interp_linear_align_corners(w, C)
    wc = np.asarray(w[..., 0]) + 1j * np.asarray(w[..., 1])
    xf = np.fft.rfft2(np.asarray(x), axes=(1, 2), norm="ortho")
    ref = np.fft.irfft2(xf * wc, s=(C, T), axes=(1, 2), norm="ortho")
    # Tolerance for four chained single-pass bf16 MXU matmuls with bf16 DFT
    # constants; outputs are O(0.02-0.1).
    err = np.max(np.abs(np.asarray(out) - ref))
    assert np.allclose(np.asarray(out), ref, atol=5e-3, rtol=3e-2), err
    print("KERNEL_OK")
</pallas_src>

<mosaic_0001>
module attributes {stable_mosaic.version = 11 : i64} {
  func.func @_gf2d_kernel(%arg0: i32, %arg1: memref<1x18x16xf32, #tpu.memory_space<vmem>>, %arg2: memref<16x18xbf16, #tpu.memory_space<vmem>>, %arg3: memref<2x18x18xbf16, #tpu.memory_space<vmem>>, %arg4: memref<2x9x18xf32, #tpu.memory_space<vmem>>, %arg5: memref<18x128xbf16, #tpu.memory_space<vmem>>, %arg6: memref<1x18x128xf32, #tpu.memory_space<vmem>>) attributes {dimension_semantics = [#tpu.dimension_semantics<parallel>], iteration_bounds = array<i64: 2>, scalar_prefetch = 0 : i64, scratch_operands = 0 : i64, tpu.core_type = #tpu.core_type<tc>, window_params = [{transform_indices = @transform_0, window_bounds = array<i64: 1, 18, 16>}, {pipeline_mode = #tpu.pipeline_mode<synchronous>, transform_indices = @transform_1, window_bounds = array<i64: 16, 18>}, {pipeline_mode = #tpu.pipeline_mode<synchronous>, transform_indices = @transform_2, window_bounds = array<i64: 2, 18, 18>}, {pipeline_mode = #tpu.pipeline_mode<synchronous>, transform_indices = @transform_3, window_bounds = array<i64: 2, 9, 18>}, {pipeline_mode = #tpu.pipeline_mode<synchronous>, transform_indices = @transform_4, window_bounds = array<i64: 18, 128>}, {transform_indices = @transform_5, window_bounds = array<i64: 1, 18, 128>}]} {
    %c0 = arith.constant 0 : index
    %c0_0 = arith.constant 0 : index
    %c0_1 = arith.constant 0 : index
    %0 = vector.load %arg1[%c0, %c0_0, %c0_1] : memref<1x18x16xf32, #tpu.memory_space<vmem>>, vector<1x18x16xf32>
    %1 = vector.shape_cast %0 : vector<1x18x16xf32> to vector<18x16xf32>
    %2 = arith.truncf %1 : vector<18x16xf32> to vector<18x16xbf16>
    %c0_2 = arith.constant 0 : index
    %c0_3 = arith.constant 0 : index
    %3 = vector.load %arg2[%c0_2, %c0_3] : memref<16x18xbf16, #tpu.memory_space<vmem>>, vector<16x18xbf16>
    %cst = arith.constant dense<0.000000e+00> : vector<18x18xf32>
    %4 = tpu.matmul %2, %3, %cst {dimension_numbers = #tpu.dot_dimension_numbers<[1], [0], [0], [1], [0, 0, 1, 1], [], []>} : vector<18x16xbf16>, vector<16x18xbf16>, vector<18x18xf32> -> vector<18x18xf32>
    %5 = vector.extract_strided_slice %4 {offsets = [0, 0], sizes = [9, 9], strides = [1, 1]} : vector<18x18xf32> to vector<9x9xf32>
    %6 = vector.extract_strided_slice %4 {offsets = [9, 0], sizes = [9, 9], strides = [1, 1]} : vector<18x18xf32> to vector<9x9xf32>
    %7 = tpu.concatenate %5, %6 in 1 : vector<9x9xf32>, vector<9x9xf32> -> vector<9x18xf32>
    %8 = vector.extract_strided_slice %4 {offsets = [0, 9], sizes = [9, 9], strides = [1, 1]} : vector<18x18xf32> to vector<9x9xf32>
    %9 = vector.extract_strided_slice %4 {offsets = [9, 9], sizes = [9, 9], strides = [1, 1]} : vector<18x18xf32> to vector<9x9xf32>
    %10 = tpu.concatenate %8, %9 in 1 : vector<9x9xf32>, vector<9x9xf32> -> vector<9x18xf32>
    %11 = tpu.concatenate %7, %10 in 0 : vector<9x18xf32>, vector<9x18xf32> -> vector<18x18xf32>
    %12 = arith.truncf %11 : vector<18x18xf32> to vector<18x18xbf16>
    %c0_4 = arith.constant 0 : index
    %c0_5 = arith.constant 0 : index
    %c0_6 = arith.constant 0 : index
    %13 = vector.load %arg3[%c0_4, %c0_5, %c0_6] : memref<2x18x18xbf16, #tpu.memory_space<vmem>>, vector<1x18x18xbf16>
    %14 = vector.shape_cast %13 : vector<1x18x18xbf16> to vector<18x18xbf16>
    %cst_7 = arith.constant dense<0.000000e+00> : vector<18x18xf32>
    %15 = tpu.matmul %14, %12, %cst_7 {dimension_numbers = #tpu.dot_dimension_numbers<[1], [0], [0], [1], [0, 0, 1, 1], [], []>} : vector<18x18xbf16>, vector<18x18xbf16>, vector<18x18xf32> -> vector<18x18xf32>
    %16 = vector.extract_strided_slice %15 {offsets = [0, 0], sizes = [9, 18], strides = [1, 1]} : vector<18x18xf32> to vector<9x18xf32>
    %17 = vector.extract_strided_slice %15 {offsets = [9, 0], sizes = [9, 18], strides = [1, 1]} : vector<18x18xf32> to vector<9x18xf32>
    %c0_8 = arith.constant 0 : index
    %c0_9 = arith.constant 0 : index
    %c0_10 = arith.constant 0 : index
    %18 = vector.load %arg4[%c0_8, %c0_9, %c0_10] : memref<2x9x18xf32, #tpu.memory_space<vmem>>, vector<1x9x18xf32>
    %19 = vector.shape_cast %18 : vector<1x9x18xf32> to vector<9x18xf32>
    %c1 = arith.constant 1 : index
    %c0_11 = arith.constant 0 : index
    %c0_12 = arith.constant 0 : index
    %20 = vector.load %arg4[%c1, %c0_11, %c0_12] : memref<2x9x18xf32, #tpu.memory_space<vmem>>, vector<1x9x18xf32>
    %21 = vector.shape_cast %20 : vector<1x9x18xf32> to vector<9x18xf32>
    %22 = arith.mulf %16, %19 : vector<9x18xf32>
    %23 = arith.mulf %17, %21 : vector<9x18xf32>
    %24 = arith.subf %22, %23 : vector<9x18xf32>
    %25 = arith.mulf %16, %21 : vector<9x18xf32>
    %26 = arith.mulf %17, %19 : vector<9x18xf32>
    %27 = arith.addf %25, %26 : vector<9x18xf32>
    %28 = tpu.concatenate %24, %27 in 0 : vector<9x18xf32>, vector<9x18xf32> -> vector<18x18xf32>
    %29 = arith.truncf %28 : vector<18x18xf32> to vector<18x18xbf16>
    %c1_13 = arith.constant 1 : index
    %c0_14 = arith.constant 0 : index
    %c0_15 = arith.constant 0 : index
    %30 = vector.load %arg3[%c1_13, %c0_14, %c0_15] : memref<2x18x18xbf16, #tpu.memory_space<vmem>>, vector<1x18x18xbf16>
    %31 = vector.shape_cast %30 : vector<1x18x18xbf16> to vector<18x18xbf16>
    %cst_16 = arith.constant dense<0.000000e+00> : vector<18x18xf32>
    %32 = tpu.matmul %31, %29, %cst_16 {dimension_numbers = #tpu.dot_dimension_numbers<[1], [0], [0], [1], [0, 0, 1, 1], [], []>} : vector<18x18xbf16>, vector<18x18xbf16>, vector<18x18xf32> -> vector<18x18xf32>
    %33 = vector.extract_strided_slice %32 {offsets = [0, 0], sizes = [9, 9], strides = [1, 1]} : vector<18x18xf32> to vector<9x9xf32>
    %34 = vector.extract_strided_slice %32 {offsets = [9, 0], sizes = [9, 9], strides = [1, 1]} : vector<18x18xf32> to vector<9x9xf32>
    %35 = tpu.concatenate %33, %34 in 1 : vector<9x9xf32>, vector<9x9xf32> -> vector<9x18xf32>
    %36 = vector.extract_strided_slice %32 {offsets = [0, 9], sizes = [9, 9], strides = [1, 1]} : vector<18x18xf32> to vector<9x9xf32>
    %37 = vector.extract_strided_slice %32 {offsets = [9, 9], sizes = [9, 9], strides = [1, 1]} : vector<18x18xf32> to vector<9x9xf32>
    %38 = tpu.concatenate %36, %37 in 1 : vector<9x9xf32>, vector<9x9xf32> -> vector<9x18xf32>
    %39 = tpu.concatenate %35, %38 in 0 : vector<9x18xf32>, vector<9x18xf32> -> vector<18x18xf32>
    %40 = arith.truncf %39 : vector<18x18xf32> to vector<18x18xbf16>
    %c0_17 = arith.constant 0 : index
    %c0_18 = arith.constant 0 : index
    %41 = vector.load %arg5[%c0_17, %c0_18] : memref<18x128xbf16, #tpu.memory_space<vmem>>, vector<18x128xbf16>
    %cst_19 = arith.constant dense<0.000000e+00> : vector<18x128xf32>
    %42 = tpu.matmul %40, %41, %cst_19 {dimension_numbers = #tpu.dot_dimension_numbers<[1], [0], [0], [1], [0, 0, 1, 1], [], []>} : vector<18x18xbf16>, vector<18x128xbf16>, vector<18x128xf32> -> vector<18x128xf32>
    %c0_20 = arith.constant 0 : index
    %c0_21 = arith.constant 0 : index
    %c0_22 = arith.constant 0 : index
    %43 = vector.load %arg6[%c0_20, %c0_21, %c0_22] : memref<1x18x128xf32, #tpu.memory_space<vmem>>, vector<1x18x128xf32>
    %44 = vector.shape_cast %43 : vector<1x18x128xf32> to vector<18x128xf32>
    %45 = vector.shape_cast %42 : vector<18x128xf32> to vector<1x18x128xf32>
    tpu.vector_store %arg6[%c0_20, %c0_21, %c0_22], %45 {strides = array<i32>} : memref<1x18x128xf32, #tpu.memory_space<vmem>>, vector<1x18x128xf32>,
    return
  }
  func.func @transform_0(%arg0: i32) -> (i32, i32, i32) {
    %c0_i32 = arith.constant 0 : i32
    %c0_i32_0 = arith.constant 0 : i32
    %c0_i32_1 = arith.constant 0 : i32
    return %arg0, %c0_i32, %c0_i32_0 : i32, i32, i32
  }
  func.func @transform_1(%arg0: i32) -> (i32, i32) {
    %c0_i32 = arith.constant 0 : i32
    %c0_i32_0 = arith.constant 0 : i32
    %c0_i32_1 = arith.constant 0 : i32
    return %c0_i32, %c0_i32_0 : i32, i32
  }
  func.func @transform_2(%arg0: i32) -> (i32, i32, i32) {
    %c0_i32 = arith.constant 0 : i32
    %c0_i32_0 = arith.constant 0 : i32
    %c0_i32_1 = arith.constant 0 : i32
    %c0_i32_2 = arith.constant 0 : i32
    return %c0_i32, %c0_i32_0, %c0_i32_1 : i32, i32, i32
  }
  func.func @transform_3(%arg0: i32) -> (i32, i32, i32) {
    %c0_i32 = arith.constant 0 : i32
    %c0_i32_0 = arith.constant 0 : i32
    %c0_i32_1 = arith.constant 0 : i32
    %c0_i32_2 = arith.constant 0 : i32
    return %c0_i32, %c0_i32_0, %c0_i32_1 : i32, i32, i32
  }
  func.func @transform_4(%arg0: i32) -> (i32, i32) {
    %c0_i32 = arith.constant 0 : i32
    %c0_i32_0 = arith.constant 0 : i32
    %c0_i32_1 = arith.constant 0 : i32
    return %c0_i32, %c0_i32_0 : i32, i32
  }
  func.func @transform_5(%arg0: i32) -> (i32, i32, i32) {
    %c0_i32 = arith.constant 0 : i32
    %c0_i32_0 = arith.constant 0 : i32
    %c0_i32_1 = arith.constant 0 : i32
    return %arg0, %c0_i32, %c0_i32_0 : i32, i32, i32
  }
}

</mosaic_0001>

<bundles_post_ra>
// kernel: tile.9
= control target key start
LH: loop header
LB: loop body
LE: loop exit
PB: predicated region body
PF: predicated region fallthrough
CT: control target
= control target key end

     0   :  { %vm92_vm0 = vcmask 1047556   ;;  %vm94_vm1 = vcmask 72704   ;;  %s118_s13 = smov 3  ;;  %s266_s14 = smov 9   ;;  %vm131_vm2 = vcmask 146504   ;;  %s371_s0 = inlined_call_operand.vmem [shape: f32[2,9,2,9], index: 0, kind: input, shape index: {}]   ;;  %s372_s1 = inlined_call_operand.vmem [shape: f32[2,9,18], index: 1, kind: output, shape index: {}]  }
   0x1   :  { %v250_v0 = vld [vmem:[%s371_s0 + $0xe] sm:$0x3]  ;;  %v251_v1 = vld [vmem:[%s371_s0 + $0xc] sm:$0x3]  ;;  %v252_v2 = vld [vmem:[%s371_s0 + $0xa] sm:$0x3] }
   0x2   :  { %58 = vst [vmem:[#allocation1 + $0x38] sm:$0x3] %v250_v0  ;;  %63 = vst [vmem:[#allocation1 + $0x30] sm:$0x3] %v251_v1  ;;  %v253_v3 = vld [vmem:[%s371_s0 + $0x8] sm:$0x3] }
   0x3   :  { %68 = vst [vmem:[#allocation1 + $0x28] sm:$0x3] %v252_v2  ;;  %v254_v4 = vld [vmem:[%s371_s0 + $0x6] sm:$0x3]  ;;  %v255_v5 = vld [vmem:[%s371_s0 + $0x4] sm:$0x3] }
   0x4   :  { %73 = vst [vmem:[#allocation1 + $0x20] sm:$0x3] %v253_v3  ;;  %78 = vst [vmem:[#allocation1 + $0x18] sm:$0x3] %v254_v4  ;;  %v256_v6 = vld [vmem:[%s371_s0 + $0x2] sm:$0x3] }
   0x5   :  { %83 = vst [vmem:[#allocation1 + $0x10] sm:$0x3] %v255_v5  ;;  %v88_v7 = vld [vmem:[%s371_s0] sm:$0x3]  ;;  %87 = vst [vmem:[#allocation1 + $0x8] sm:$0x3] %v256_v6 }
   0x6   :  { %89 = vst [vmem:[#allocation1] sm:$0x3] %v88_v7  ;;  %v242_v8 = vld [vmem:[%s371_s0 + $0x1e] sm:$0x3]  ;;  %v243_v9 = vld [vmem:[%s371_s0 + $0x1c] sm:$0x3] }
   0x7   :  { %v244_v10 = vld [vmem:[%s371_s0 + $0x1a] sm:$0x3]  ;;  %18 = vst [vmem:[#allocation1 + $0x78] sm:$0x3] %v242_v8  ;;  %23 = vst [vmem:[#allocation1 + $0x70] sm:$0x3] %v243_v9 }
   0x8   :  { %28 = vst [vmem:[#allocation1 + $0x68] sm:$0x3] %v244_v10  ;;  %v245_v11 = vld [vmem:[%s371_s0 + $0x18] sm:$0x3]  ;;  %v246_v12 = vld [vmem:[%s371_s0 + $0x16] sm:$0x3] }
   0x9   :  { %v247_v13 = vld [vmem:[%s371_s0 + $0x14] sm:$0x3]  ;;  %33 = vst [vmem:[#allocation1 + $0x60] sm:$0x3] %v245_v11  ;;  %38 = vst [vmem:[#allocation1 + $0x58] sm:$0x3] %v246_v12 }
   0xa   :  { %43 = vst [vmem:[#allocation1 + $0x50] sm:$0x3] %v247_v13  ;;  %v248_v14 = vld [vmem:[%s371_s0 + $0x12] sm:$0x3]  ;;  %v249_v15 = vld [vmem:[%s371_s0 + $0x10] sm:$0x3] }
   0xb   :  { %v240_v16 = vld [vmem:[%s371_s0 + $0x22] sm:$0x3]  ;;  %48 = vst [vmem:[#allocation1 + $0x48] sm:$0x3] %v248_v14  ;;  %53 = vst [vmem:[#allocation1 + $0x40] sm:$0x3] %v249_v15 }
   0xc   :  { %8 = vst [vmem:[#allocation1 + $0x88] sm:$0x3] %v240_v16  ;;  %v241_v17 = vld [vmem:[%s371_s0 + $0x20] sm:$0x3]  ;;  %s157_s0 = smov 3 }
   0xd   :  { %13 = vst [vmem:[#allocation1 + $0x80] sm:$0x3] %v241_v17  ;;  %v126_v18 = vld [vmem:[#allocation1 + $0x1] ss:$8 sm:$0xf0]  }
   0xe   :  { %v91_v19 = vld [vmem:[#allocation1] ss:$8 sm:$0xf0]   ;;  %v124_v21 = vld [vmem:[#allocation1 + $0x1] ss:$8 sm:$0xf]  }
   0xf   :  { %v90_v20 = vld [vmem:[#allocation1] ss:$8 sm:$0xf]   ;;  %v128_v22 = vsel %vm92_vm0, %v126_v18, %v124_v21 }
  0x10   :  { %v93_v23 = vsel %vm92_vm0, %v91_v19, %v90_v20  ;;  %129 = vrot.lane.b32.xlu0 %v128_v22, %s266_s14  ;;  %v105_v24 = vld [vmem:[#allocation1 + $0x40] ss:$8 sm:$0xf0]   ;;  %v142_v25 = vld [vmem:[#allocation1 + $0x41] ss:$8 sm:$0xf0]  }
  0x11   :  { %95 = vst.msk [vmem:[#allocation0] sm:$0x3] %vm94_vm1, %v93_v23   ;;  %97 = vst.msk [vmem:[#allocation0 + $0x6] sm:$0xc] %vm94_vm1, %v93_v23  }
  0x12   :  { %99 = vst.msk [vmem:[#allocation0 + $0xc] sm:$0x30] %vm94_vm1, %v93_v23   ;;  %101 = vst.msk [vmem:[#allocation0 + $0x12] sm:$0xc0] %vm94_vm1, %v93_v23  }
  0x13   :  { %v103_v26 = vld [vmem:[#allocation1 + $0x40] ss:$8 sm:$0xf]   ;;  %v140_v27 = vld [vmem:[#allocation1 + $0x41] ss:$8 sm:$0xf]  }
  0x14   :  { %v107_v28 = vsel %vm92_vm0, %v105_v24, %v103_v26  ;;  %v144_v29 = vsel %vm92_vm0, %v142_v25, %v140_v27  ;;  %v158_v30 = vld [vmem:[#allocation1 + $0x81] ss:$8 sm:%s157_s0]   ;;  %v119_v31 = vld [vmem:[#allocation1 + $0x80] ss:$8 sm:%s118_s13]  }
  0x15   :  { %159 = vrot.lane.b32.xlu1 %v158_v30, %s266_s14  ;;  %110 = vst.msk [vmem:[#allocation0 + $0x20] sm:$0x3] %vm94_vm1, %v107_v28   ;;  %112 = vst.msk [vmem:[#allocation0 + $0x26] sm:$0xc] %vm94_vm1, %v107_v28   ;;  %145 = vrot.lane.b32.xlu0 %v144_v29, %s266_s14 }
  0x16   :  { %114 = vst.msk [vmem:[#allocation0 + $0x2c] sm:$0x30] %vm94_vm1, %v107_v28   ;;  %116 = vst.msk [vmem:[#allocation0 + $0x32] sm:$0xc0] %vm94_vm1, %v107_v28  }
  0x17   :  { %122 = vst.msk [vmem:[#allocation0 + $0x40] sm:$0x3] %vm94_vm1, %v119_v31  }
  0x82   :  { %v130_v32 = vpop.permute.xlu0 %129  }
  0x83   :  { %132 = vst.msk [vmem:[#allocation0] sm:$0x3] %vm131_vm2, %v130_v32   ;;  %134 = vst.msk [vmem:[#allocation0 + $0x6] sm:$0xc] %vm131_vm2, %v130_v32  }
  0x84   :  { %136 = vst.msk [vmem:[#allocation0 + $0xc] sm:$0x30] %vm131_vm2, %v130_v32   ;;  %138 = vst.msk [vmem:[#allocation0 + $0x12] sm:$0xc0] %vm131_vm2, %v130_v32  }
  0x87   :  { %v160_v33 = vpop.permute.xlu1 %159   ;;  %v146_v34 = vpop.permute.xlu0 %145  }
  0x88   :  { %163 = vst.msk [vmem:[#allocation0 + $0x40] sm:$0x3] %vm131_vm2, %v160_v33   ;;  %149 = vst.msk [vmem:[#allocation0 + $0x20] sm:$0x3] %vm131_vm2, %v146_v34  }
  0x89   :  { %151 = vst.msk [vmem:[#allocation0 + $0x26] sm:$0xc] %vm131_vm2, %v146_v34   ;;  %153 = vst.msk [vmem:[#allocation0 + $0x2c] sm:$0x30] %vm131_vm2, %v146_v34  }
  0x8a   :  { %155 = vst.msk [vmem:[#allocation0 + $0x32] sm:$0xc0] %vm131_vm2, %v146_v34   ;;  %v167_v35 = vld [vmem:[#allocation0] sm:$0x3]  ;;  %v171_v36 = vld [vmem:[#allocation0 + $0x8] sm:$0x3] }
  0x8b   :  { %v176_v37 = vld [vmem:[#allocation0 + $0x10] sm:$0x3]  ;;  %169 = vst [vmem:[%s372_s1] sm:$0x3] %v167_v35  ;;  %257 = vst [vmem:[%s372_s1 + $0x2] sm:$0x3] %v171_v36 }
  0x8c   :  { %258 = vst [vmem:[%s372_s1 + $0x4] sm:$0x3] %v176_v37  ;;  %v182_v38 = vld [vmem:[#allocation0 + $0x18] sm:$0x3] }
  0x8d   :  { %259 = vst [vmem:[%s372_s1 + $0x6] sm:$0x3] %v182_v38 }
  0x8f   :  { %v212_v39 = vld [vmem:[#allocation0 + $0x40] sm:$0x3] }
  0x90   :  { %v188_v40 = vld [vmem:[#allocation0 + $0x20] sm:$0x3]  ;;  %v194_v41 = vld [vmem:[#allocation0 + $0x28] sm:$0x3]  ;;  %v200_v42 = vld [vmem:[#allocation0 + $0x30] sm:$0x3] }
  0x91   :  { %264 = vst [vmem:[%s372_s1 + $0x10] sm:$0x3] %v212_v39  ;;  %260 = vst [vmem:[%s372_s1 + $0x8] sm:$0x3] %v188_v40  ;;  %v206_v43 = vld [vmem:[#allocation0 + $0x38] sm:$0x3] }
  0x92   :  { %261 = vst [vmem:[%s372_s1 + $0xa] sm:$0x3] %v194_v41  ;;  %262 = vst [vmem:[%s372_s1 + $0xc] sm:$0x3] %v200_v42 }
  0x93   :  { %263 = vst [vmem:[%s372_s1 + $0xe] sm:$0x3] %v206_v43 }

// kernel: gf2d_forward.1
= control target key start
LH: loop header
LB: loop body
LE: loop exit
PB: predicated region body
PF: predicated region fallthrough
CT: control target
= control target key end

     0   :  { %s835_s18 = smov 0   ;;  %s929_s0 = inlined_call_operand.vmem [shape: f32[2,18,16], index: 0, kind: input, shape index: {}]   ;;  %s930_s1 = inlined_call_operand.vmem [shape: bf16[16,18], index: 1, kind: input, shape index: {}]   ;;  %s931_s2 = inlined_call_operand.vmem [shape: bf16[2,18,18], index: 2, kind: input, shape index: {}]   ;;  %s932_s3 = inlined_call_operand.vmem [shape: f32[2,9,18], index: 3, kind: input, shape index: {}]   ;;  %s933_s4 = inlined_call_operand.vmem [shape: bf16[18,128], index: 4, kind: input, shape index: {}]   ;;  %s934_s5 = inlined_call_operand.vmem [shape: f32[2,18,128], index: 5, kind: output, shape index: {}]  }
   0x1 LB: > { %s685_s19 = sadd.s32 4294967295, %s801_s18   ;;  %p689_p0 = scmp.ge.s32.totalorder %s801_s18, 1  ;;  %s801_s18 = sphi %s835_s18, %s15_s18  }
   0x2   : > { %p187_p1 = scmp.lt.s32.totalorder %s801_s18, 3 }
   0x4   : > { %p188_p2 = pnand %p689_p0, %p187_p1 }
   0x5   : > { %v788_v0 = vld [vmem:[%s930_s1] sm:$0xff] (!%p188_p2)   ;;  %p215_p3 = scmp.lt.s32.totalorder (!%p188_p2), %s685_s19, 1  ;;  %vm239_vm0 = vcmask (!%p188_p2), 130048   ;;  %s803_s26 = smov (!%p188_p2), 119   ;;  %vm296_vm1 = vcmask (!%p188_p2), 1046528   ;;  %vm342_vm2 = vcmask (!%p188_p2), 146432  }
   0x6   : > { %191 = sbr.rel (%p188_p2) target bundleno = 1163 (0x48b), region = 40  ;;  %729 = vmatprep.subr.bf16.mxu0 (!%p188_p2), %v788_v0  ;;  %v789_v14 = vld [vmem:[%s931_s2] sm:$0xff] (!%p188_p2)   ;;  %s804_s29 = smov (!%p188_p2), 9   ;;  %vm306_vm3 = vcmask (!%p188_p2), 72704   ;;  %vm322_vm4 = vcmask (!%p188_p2), 1040384   ;;  %v791_v32 = vld [vmem:[%s931_s2 + $0xc] sm:$0xff] (!%p188_p2)  }
   0x7   : > { %730 = vmatpush3.bf16.msra.mxu0 (!%p188_p2), %v788_v0  ;;  %739 = vmatprep.mubr.msk.bf16.mxu1 (!%p188_p2), %vm342_vm2, %v789_v14  ;;  %v790_v31 = vld [vmem:[%s931_s2 + $0x8] ss:$0 sps:$4 sm:$0x11] (!%p188_p2)   ;;  %v400_v33 = vld [vmem:[%s932_s3] sm:$0xff] (!%p188_p2)  ;;  %v699_v35 = vld [vmem:[%s932_s3 + $0x10] sm:$0xff] (!%p188_p2) }
   0x8   : > { %v401_v34 = vld [vmem:[%s932_s3 + $0x8] sm:$0x1] (!%p188_p2)  ;;  %v700_v36 = vld [vmem:[%s932_s3 + $0x18] sm:$0x1] (!%p188_p2)  ;;  %v409_v37 = vrot.slane (!%p188_p2), %v699_v35, 7  ;;  %v429_v39 = vrot.slane (!%p188_p2), %v400_v33, 7 }
   0x9   : > { %v410_v38 = vrot.slane (!%p188_p2), %v700_v36, 7  ;;  %v430_v40 = vrot.slane (!%p188_p2), %v401_v34, 7 }
   0xb   : > { %v411_v41 = vsel (!%p188_p2), %vm322_vm4, %v409_v37, %v410_v38  ;;  %v431_v42 = vsel (!%p188_p2), %vm322_vm4, %v429_v39, %v430_v40 }
   0xd   : > { %s936_s19 = smov (!%p215_p3, %s685_s19), 1 }
   0xe   : > { %s762_s22 = smul.u32 24, %s936_s19 }
  0x10   : > { %s219_s25 = scalar_lea.vmem %s929_s0, %s762_s22  ;;  %s224_s28 = scalar_lea.vmem %s934_s5, %s762_s22 }
  0x11   : > { %v226_v1 = vld [vmem:[%s219_s25] sm:$0xff]  ;;  %v227_v2 = vld [vmem:[%s219_s25 + $0x8] sm:$0xff]  ;;  %v228_v3 = vld [vmem:[%s219_s25 + $0x10] sm:$0x3] }
  0x12   : > { %v229_v4 = vpack.c.bf16 %v227_v2, %v226_v1  ;;  %v230_v5 = vpack.c.bf16 %v228_v3, %v228_v3 }
  0x14   : > { %731 = vmatprep.mubr.msk.bf16.mxu0 %vm239_vm0, %v229_v4 }
  0x15   : > { %732 = vmatmul.mubr.msk.bf16.vlgmr.msra.gmra.mrb[0].mxu0 %vm239_vm0, %v230_v5 }
  0x16   : > { %747 = vmatprep.mubr.msk.bf16.mxu0 %vm342_vm2, %v791_v32 }
  0xe8   : > { %v733_v6 = vpop.f32.mrb[0].mxu0 }
  0xe9   : > { %v280_v7 = vpop.f32.mrb[1].mxu0  ;;  %v298_v10 = vrot.slane %v733_v6, 1 }
  0xea   : > { %310 = vrot.lane.b32.xlu0 %v280_v7, %s803_s26  ;;  %v734_v8 = vpop.f32.mrb[2].mxu0 }
  0xeb   : > { %v283_v9 = vpop.f32.mrb[3].mxu0  ;;  %v792_v8 = vld [vmem:[%s931_s2 + $0x14] ss:$0 sps:$4 sm:$0x11]  }
  0xec   : > { %v297_v11 = vrot.slane %v283_v9, 1  ;;  %312 = vrot.lane.b32.xlu1 %v283_v9, %s803_s26 }
  0xee   : > { %v299_v12 = vsel %vm296_vm1, %v297_v11, %v298_v10 }
  0xef   : > { %v773_v13 = vpack.i.bf16 %v299_v12, %v298_v10 }
  0xf1   : > { %774 = vrot.lane.b32.xlu0 %v773_v13, %s804_s29 }
 0x15c   : > { %v311_v16 = vpop.permute.xlu0 %310 }
 0x15d   : > { %v318_v18 = vsel %vm306_vm3, %v311_v16, %v299_v12 }
 0x15e   : > { %v313_v15 = vpop.permute.xlu1 %312  ;;  %v323_v23 = vrot.slane %v318_v18, 7 }
 0x15f   : > { %v319_v17 = vsel %vm306_vm3, %v313_v15, %v298_v10  ;;  %v794_v10 = vld [vmem:[%s933_s4 + $0x8] ss:$0 sps:$4 sm:$0x11]  }
 0x160   : > { %v324_v19 = vrot.slane %v319_v17, 7  ;;  %v577_v11 = vsel %vm322_vm4, %v794_v10, 0 }
 0x162   : > { %v325_v26 = vsel %vm322_vm4, %v323_v23, %v324_v19 }
 0x163   : > { %v775_v20 = vpop.permute.xlu0 %774  ;;  %v330_v29 = vpack.c.bf16 %v325_v26, %v325_v26 }
 0x164   : > { %v777_v21 = vunpack.i.h.bf16 %v775_v20  ;;  %v776_v22 = vunpack.i.l.bf16 %v775_v20 }
 0x165   : > { %v350_v30 = vsel %vm322_vm4, %v330_v29, 0 }
 0x166   : > { %v307_v24 = vsel %vm306_vm3, %v280_v7, %v777_v21  ;;  %v308_v25 = vsel %vm306_vm3, %v283_v9, %v776_v22  ;;  %v793_v9 = vld [vmem:[%s933_s4] sm:$0xff]  }
 0x167   : > { %v328_v27 = vsel %vm322_vm4, %v308_v25, %v323_v23 }
 0x168   : > { %v329_v28 = vpack.c.bf16 %v328_v27, %v307_v24 }
 0x16a   : > { %735 = vmatprep.subr.bf16.mxu1 %v329_v28 }
 0x16b   : > { %736 = vmatpush3.bf16.msra.mxu1 %v329_v28 }
 0x16c   : > { %759 = vmatprep.subr.msk.bf16.mxu1 %vm322_vm4, %v330_v29 }
 0x16f   : > { %738 = vmatpush3.bf16.msra.mxu1 %v350_v30 }
 0x170   : > { %751 = vmatprep.subr.bf16.mxu1 %v793_v9 }
 0x172   : > { %740 = vmatmul.mubr.msk.bf16.vlgmr.msra.gmra.mrb[0].mxu1 %vm342_vm2, %v790_v31 }
 0x173   : > { %752 = vmatpush3.bf16.msra.mxu1 %v793_v9 }
 0x174   : > { %761 = vmatprep.subr.msk.bf16.mxu1 %vm322_vm4, %v794_v10 }
 0x177   : > { %754 = vmatpush3.bf16.msra.mxu1 %v577_v11 }
 0x245   : > { %v741_v43 = vpop.f32.mrb[0].mxu1 }
 0x246   : > { %v415_v44 = vmul.f32 %v741_v43, %v411_v41  ;;  %v435_v45 = vmul.f32 %v741_v43, %v431_v42  ;;  %v386_v46 = vpop.f32.mrb[1].mxu1 }
 0x247   : > { %v742_v47 = vpop.f32.mrb[2].mxu1  ;;  %v405_v59 = vmul.f32 %v400_v33, %v386_v46  ;;  %v425_v60 = vmul.f32 %v699_v35, %v386_v46 }
 0x248   : > { %v419_v48 = vrot.slane %v415_v44, 1  ;;  %v439_v49 = vrot.slane %v435_v45, 1  ;;  %v389_v50 = vpop.f32.mrb[3].mxu1 }
 0x249   : > { %v406_v51 = vmul.f32 %v401_v34, %v389_v50  ;;  %v414_v52 = vmul.f32 %v409_v37, %v389_v50  ;;  %v426_v53 = vmul.f32 %v700_v36, %v389_v50  ;;  %v434_v54 = vmul.f32 %v429_v39, %v389_v50 }
 0x24b   : > { %v418_v55 = vrot.slane %v414_v52, 1  ;;  %v424_v56 = vsub.f32 %v406_v51, %v419_v48  ;;  %v438_v57 = vrot.slane %v434_v54, 1  ;;  %v444_v58 = vadd.f32 %v439_v49, %v426_v53 }
 0x24d   : > { %v440_v61 = vsel %vm296_vm1, %v438_v57, %v439_v49  ;;  %v420_v62 = vsel %vm296_vm1, %v418_v55, %v419_v48  ;;  %v448_v1 = vrot.slane %v444_v58, 7 }
 0x24e   : > { %v423_v63 = vsub.f32 %v405_v59, %v420_v62  ;;  %v443_v0 = vadd.f32 %v440_v61, %v425_v60 }
 0x250   : > { %v447_v2 = vrot.slane %v443_v0, 7 }
 0x252   : > { %v452_v3 = vsel %vm322_vm4, %v424_v56, %v447_v2  ;;  %v449_v4 = vsel %vm322_vm4, %v447_v2, %v448_v1 }
 0x253   : > { %v453_v5 = vpack.c.bf16 %v452_v3, %v423_v63  ;;  %v454_v6 = vpack.c.bf16 %v449_v4, %v449_v4 }
 0x255   : > { %743 = vmatprep.subr.bf16.mxu0 %v453_v5  ;;  %v474_v7 = vsel %vm322_vm4, %v454_v6, 0 }
 0x256   : > { %744 = vmatpush3.bf16.msra.mxu0 %v453_v5 }
 0x257   : > { %760 = vmatprep.subr.msk.bf16.mxu0 %vm322_vm4, %v454_v6 }
 0x25a   : > { %746 = vmatpush3.bf16.msra.mxu0 %v474_v7 }
 0x25d   : > { %748 = vmatmul.mubr.msk.bf16.vlgmr.msra.gmra.mrb[4].mxu0 %vm342_vm2, %v792_v8 }
 0x330   : > { %v749_v12 = vpop.f32.mrb[4].mxu0 }
 0x331   : > { %v510_v13 = vpop.f32.mrb[5].mxu0  ;;  %v527_v16 = vrot.slane %v749_v12, 1 }
 0x332   : > { %v750_v14 = vpop.f32.mrb[6].mxu0 }
 0x333   : > { %v513_v15 = vpop.f32.mrb[7].mxu0 }
 0x334   : > { %v778_v17 = vpack.i.bf16 %v513_v15, %v510_v13  ;;  %v526_v18 = vrot.slane %v513_v15, 1 }
 0x336   : > { %779 = vrot.lane.b32.xlu1 %v778_v17, %s803_s26  ;;  %v528_v19 = vsel %vm296_vm1, %v526_v18, %v527_v16 }
 0x337   : > { %v783_v20 = vpack.i.bf16 %v528_v19, %v527_v16 }
 0x339   : > { %784 = vrot.lane.b32.xlu0 %v783_v20, %s804_s29 }
 0x3a8   : > { %v780_v21 = vpop.permute.xlu1 %779 }
 0x3a9   : > { %v782_v22 = vunpack.i.h.bf16 %v780_v21  ;;  %v781_v23 = vunpack.i.l.bf16 %v780_v21 }
 0x3ab   : > { %v547_v24 = vsel %vm306_vm3, %v782_v22, %v527_v16  ;;  %v546_v25 = vsel %vm306_vm3, %v781_v23, %v528_v19  ;;  %v785_v26 = vpop.permute.xlu0 %784 }
 0x3ac   : > { %v551_v27 = vrot.slane %v547_v24, 7  ;;  %v550_v28 = vrot.slane %v546_v25, 7  ;;  %v787_v29 = vunpack.i.h.bf16 %v785_v26  ;;  %v786_v30 = vunpack.i.l.bf16 %v785_v26 }
 0x3ae   : > { %v552_v31 = vsel %vm322_vm4, %v550_v28, %v551_v27  ;;  %v535_v32 = vsel %vm306_vm3, %v510_v13, %v787_v29  ;;  %v536_v33 = vsel %vm306_vm3, %v513_v15, %v786_v30 }
 0x3af   : > { %v555_v34 = vsel %vm322_vm4, %v536_v33, %v550_v28  ;;  %v557_v36 = vpack.c.bf16 %v552_v31, %v552_v31 }
 0x3b0   : > { %v556_v35 = vpack.c.bf16 %v555_v34, %v535_v32 }
 0x3b2   : > { %755 = vmatprep.mubr.msk.bf16.mxu1 %vm342_vm2, %v556_v35 }
 0x3b3   : > { %756 = vmatmul.mubr.msk.bf16.vlgmr.msra.gmra.mrb[4].mxu1 %vm342_vm2, %v557_v36 }
 0x486   : > { %v757_v37 = vpop.f32.mrb[4].mxu1 }
 0x487   : > { %629 = vst [vmem:[%s224_s28 + $0x10] sm:$0x3] %v757_v37  ;;  %v613_v38 = vpop.f32.mrb[5].mxu1 }
 0x488   : > { %627 = vst [vmem:[%s224_s28] sm:$0xff] %v613_v38  ;;  %v758_v39 = vpop.f32.mrb[6].mxu1 }
 0x489   : > { %v616_v40 = vpop.f32.mrb[7].mxu1 }
 0x48a   : > { %628 = vst [vmem:[%s224_s28 + $0x8] sm:$0xff] %v616_v40 }
 0x48b PF: > { %s15_s18 = sadd.s32 1, %s801_s18  }
 0x48c   : > { %p12_p4 = scmp.ge.s32.totalorder %s15_s18, 4  }
 0x48e   :  { %14 = sbr.rel (!%p12_p4) target bundleno = 1 (0x1), region = 72 }

</bundles_post_ra>
